<compile_context>
chip_gen: v6e
topology: v6e:2x2x1
jax: 0.10.0
libtpu: 0.0.40
codegen_flags: <defaults>
</compile_context>

<pallas_src>
import functools

import numpy as np
import jax
import jax.numpy as jnp
from jax.experimental import pallas as pl
from jax.experimental.pallas import tpu as pltpu

EPS = 1e-6


# ------------------------------- Pallas kernel -------------------------------

def _adagn_kernel(x_ref, gamma_ref, beta_ref, o_ref, *, inv_n):
    # x_ref:     (1, 1, cg, HW)  -- one full normalization group of one sample
    # gamma/beta:(1, 1, cg, 1)   -- per-channel modulation for this group
    x = x_ref[0, 0]                                                    # (cg, HW) f32

    # two-pass (centered) group statistics: lane reduce (XLU) then sublane reduce
    mean = jnp.sum(jnp.sum(x, axis=1, keepdims=True),
                   axis=0, keepdims=True) * inv_n                      # (1, 1)
    xc = x - mean
    var = jnp.sum(jnp.sum(xc * xc, axis=1, keepdims=True),
                  axis=0, keepdims=True) * inv_n                       # (1, 1)
    inv = jax.lax.rsqrt(var + EPS)

    # normalize + adaptive affine, single lane-dense store
    o_ref[0, 0] = xc * (inv * gamma_ref[0, 0]) + beta_ref[0, 0]


# ------------------------------- wrapper -------------------------------------

def adaptive_group_norm(x_nchw, style, style_w, style_b, num_groups):
    """AdaptiveGroupNorm forward. x_nchw: (N,C,H,W); style: (N, style_dim)."""
    N, C, H, W = x_nchw.shape
    G = num_groups
    assert C % G == 0
    cg = C // G
    HW = H * W

    # NCHW -> (N, G, cg, HW): pure reshape, channels stay grouped, HW on lanes.
    x = x_nchw.astype(jnp.float32).reshape(N, G, cg, HW)

    # Tiny style projection: keep it in XLA (2 rows would waste a pallas_call).
    s = jnp.dot(style.astype(jnp.float32), style_w) + style_b          # (N, 2C)
    gamma = s[:, :C].reshape(N, G, cg, 1)
    beta = s[:, C:].reshape(N, G, cg, 1)

    kernel = functools.partial(_adagn_kernel, inv_n=1.0 / float(cg * HW))

    out = pl.pallas_call(
        kernel,
        out_shape=jax.ShapeDtypeStruct((N, G, cg, HW), jnp.float32),
        grid=(N, G),
        in_specs=[
            pl.BlockSpec((1, 1, cg, HW), lambda n, g: (n, g, 0, 0)),
            pl.BlockSpec((1, 1, cg, 1), lambda n, g: (n, g, 0, 0)),
            pl.BlockSpec((1, 1, cg, 1), lambda n, g: (n, g, 0, 0)),
        ],
        out_specs=pl.BlockSpec((1, 1, cg, HW), lambda n, g: (n, g, 0, 0)),
        compiler_params=pltpu.CompilerParams(
            dimension_semantics=("parallel", "parallel"),
            vmem_limit_bytes=32 * 1024 * 1024,
        ),
    )(x, gamma, beta)

    return out.reshape(N, C, H, W)


# --------------------------- pure-JAX reference -------------------------------

def ref_adaptive_group_norm(x, style, style_w, style_b, G):
    N, C, H, W = x.shape
    s = jnp.dot(style, style_w) + style_b
    gamma = s[:, :C][:, :, None, None]
    beta = s[:, C:][:, :, None, None]
    xr = x.reshape(N, G, -1)
    mean = xr.mean(-1, keepdims=True)
    var = xr.var(-1, keepdims=True)
    xn = ((xr - mean) / jnp.sqrt(var + EPS)).reshape(N, C, H, W)
    return gamma * xn + beta


# ----------------------------------- main -------------------------------------

if __name__ == "__main__":
    key = jax.random.PRNGKey(0)
    N, H, W = 2, 16, 16
    style_dim = 32

    # (channels, num_groups): single-group and multi-group configurations.
    for C, G in [(4, 1), (8, 2)]:
        kx, ks, kw, key = jax.random.split(key, 4)
        x = jax.random.normal(kx, (N, C, H, W), jnp.float32)
        style = jax.random.normal(ks, (N, style_dim), jnp.float32)
        style_w = 0.2 * jax.random.normal(kw, (style_dim, 2 * C), jnp.float32)
        style_b = jnp.concatenate(
            [jnp.ones((C,), jnp.float32), jnp.zeros((C,), jnp.float32)])

        out = jax.block_until_ready(
            adaptive_group_norm(x, style, style_w, style_b, G))
        assert out.shape == (N, C, H, W)

        ref = ref_adaptive_group_norm(x, style, style_w, style_b, G)
        np.testing.assert_allclose(np.asarray(out), np.asarray(ref),
                                   rtol=1e-4, atol=1e-4)

    print("KERNEL_OK")
</pallas_src>

<mosaic_0001>
module attributes {stable_mosaic.version = 11 : i64} {
  func.func @_adagn_kernel(%arg0: i32, %arg1: i32, %arg2: memref<1x1x4x256xf32, #tpu.memory_space<vmem>>, %arg3: memref<1x1x4x1xf32, #tpu.memory_space<vmem>>, %arg4: memref<1x1x4x1xf32, #tpu.memory_space<vmem>>, %arg5: memref<1x1x4x256xf32, #tpu.memory_space<vmem>>) attributes {dimension_semantics = [#tpu.dimension_semantics<parallel>, #tpu.dimension_semantics<parallel>], iteration_bounds = array<i64: 2, 1>, scalar_prefetch = 0 : i64, scratch_operands = 0 : i64, tpu.core_type = #tpu.core_type<tc>, window_params = [{transform_indices = @transform_0, window_bounds = array<i64: 1, 1, 4, 256>}, {transform_indices = @transform_1, window_bounds = array<i64: 1, 1, 4, 1>}, {transform_indices = @transform_2, window_bounds = array<i64: 1, 1, 4, 1>}, {transform_indices = @transform_3, window_bounds = array<i64: 1, 1, 4, 256>}]} {
    %c0 = arith.constant 0 : index
    %c0_0 = arith.constant 0 : index
    %c0_1 = arith.constant 0 : index
    %c0_2 = arith.constant 0 : index
    %0 = vector.load %arg2[%c0, %c0_0, %c0_1, %c0_2] : memref<1x1x4x256xf32, #tpu.memory_space<vmem>>, vector<1x1x4x256xf32>
    %1 = vector.shape_cast %0 : vector<1x1x4x256xf32> to vector<4x256xf32>
    %cst = arith.constant dense<0.000000e+00> : vector<4xf32>
    %2 = vector.multi_reduction <add>, %1, %cst [1] : vector<4x256xf32> to vector<4xf32>
    %3 = vector.shape_cast %2 : vector<4xf32> to vector<4x1xf32>
    %cst_3 = arith.constant dense<0.000000e+00> : vector<1xf32>
    %4 = vector.multi_reduction <add>, %3, %cst_3 [0] : vector<4x1xf32> to vector<1xf32>
    %5 = vector.shape_cast %4 : vector<1xf32> to vector<1x1xf32>
    %cst_4 = arith.constant 9.765625E-4 : f32
    %6 = vector.broadcast %cst_4 : f32 to vector<1x1xf32>
    %7 = arith.mulf %5, %6 : vector<1x1xf32>
    %8 = vector.broadcast %7 : vector<1x1xf32> to vector<4x256xf32>
    %9 = arith.subf %1, %8 : vector<4x256xf32>
    %10 = arith.mulf %9, %9 : vector<4x256xf32>
    %cst_5 = arith.constant dense<0.000000e+00> : vector<4xf32>
    %11 = vector.multi_reduction <add>, %10, %cst_5 [1] : vector<4x256xf32> to vector<4xf32>
    %12 = vector.shape_cast %11 : vector<4xf32> to vector<4x1xf32>
    %cst_6 = arith.constant dense<0.000000e+00> : vector<1xf32>
    %13 = vector.multi_reduction <add>, %12, %cst_6 [0] : vector<4x1xf32> to vector<1xf32>
    %14 = vector.shape_cast %13 : vector<1xf32> to vector<1x1xf32>
    %cst_7 = arith.constant 9.765625E-4 : f32
    %15 = vector.broadcast %cst_7 : f32 to vector<1x1xf32>
    %16 = arith.mulf %14, %15 : vector<1x1xf32>
    %cst_8 = arith.constant 9.99999997E-7 : f32
    %17 = vector.broadcast %cst_8 : f32 to vector<1x1xf32>
    %18 = arith.addf %16, %17 : vector<1x1xf32>
    %19 = math.rsqrt %18 : vector<1x1xf32>
    %c0_9 = arith.constant 0 : index
    %c0_10 = arith.constant 0 : index
    %c0_11 = arith.constant 0 : index
    %c0_12 = arith.constant 0 : index
    %20 = vector.load %arg3[%c0_9, %c0_10, %c0_11, %c0_12] : memref<1x1x4x1xf32, #tpu.memory_space<vmem>>, vector<1x1x4x1xf32>
    %21 = vector.shape_cast %20 : vector<1x1x4x1xf32> to vector<4x1xf32>
    %22 = vector.broadcast %19 : vector<1x1xf32> to vector<4x1xf32>
    %23 = arith.mulf %22, %21 : vector<4x1xf32>
    %24 = vector.broadcast %23 : vector<4x1xf32> to vector<4x256xf32>
    %25 = arith.mulf %9, %24 : vector<4x256xf32>
    %c0_13 = arith.constant 0 : index
    %c0_14 = arith.constant 0 : index
    %c0_15 = arith.constant 0 : index
    %c0_16 = arith.constant 0 : index
    %26 = vector.load %arg4[%c0_13, %c0_14, %c0_15, %c0_16] : memref<1x1x4x1xf32, #tpu.memory_space<vmem>>, vector<1x1x4x1xf32>
    %27 = vector.shape_cast %26 : vector<1x1x4x1xf32> to vector<4x1xf32>
    %28 = vector.broadcast %27 : vector<4x1xf32> to vector<4x256xf32>
    %29 = arith.addf %25, %28 : vector<4x256xf32>
    %c0_17 = arith.constant 0 : index
    %c0_18 = arith.constant 0 : index
    %c0_19 = arith.constant 0 : index
    %c0_20 = arith.constant 0 : index
    %30 = vector.load %arg5[%c0_17, %c0_18, %c0_19, %c0_20] : memref<1x1x4x256xf32, #tpu.memory_space<vmem>>, vector<1x1x4x256xf32>
    %31 = vector.shape_cast %30 : vector<1x1x4x256xf32> to vector<4x256xf32>
    %32 = vector.shape_cast %29 : vector<4x256xf32> to vector<1x1x4x256xf32>
    tpu.vector_store %arg5[%c0_17, %c0_18, %c0_19, %c0_20], %32 {strides = array<i32>} : memref<1x1x4x256xf32, #tpu.memory_space<vmem>>, vector<1x1x4x256xf32>,
    return
  }
  func.func @transform_0(%arg0: i32, %arg1: i32) -> (i32, i32, i32, i32) {
    %c0_i32 = arith.constant 0 : i32
    %c0_i32_0 = arith.constant 0 : i32
    %c0_i32_1 = arith.constant 0 : i32
    return %arg0, %arg1, %c0_i32, %c0_i32_0 : i32, i32, i32, i32
  }
  func.func @transform_1(%arg0: i32, %arg1: i32) -> (i32, i32, i32, i32) {
    %c0_i32 = arith.constant 0 : i32
    %c0_i32_0 = arith.constant 0 : i32
    %c0_i32_1 = arith.constant 0 : i32
    return %arg0, %arg1, %c0_i32, %c0_i32_0 : i32, i32, i32, i32
  }
  func.func @transform_2(%arg0: i32, %arg1: i32) -> (i32, i32, i32, i32) {
    %c0_i32 = arith.constant 0 : i32
    %c0_i32_0 = arith.constant 0 : i32
    %c0_i32_1 = arith.constant 0 : i32
    return %arg0, %arg1, %c0_i32, %c0_i32_0 : i32, i32, i32, i32
  }
  func.func @transform_3(%arg0: i32, %arg1: i32) -> (i32, i32, i32, i32) {
    %c0_i32 = arith.constant 0 : i32
    %c0_i32_0 = arith.constant 0 : i32
    %c0_i32_1 = arith.constant 0 : i32
    return %arg0, %arg1, %c0_i32, %c0_i32_0 : i32, i32, i32, i32
  }
}

</mosaic_0001>

<bundles_post_ra>
// kernel: tpu_custom_call.1
= control target key start
LH: loop header
LB: loop body
LE: loop exit
PB: predicated region body
PF: predicated region fallthrough
CT: control target
= control target key end

     0   :  { %8 = vsyncpa [#allocation3], 0  ;;  %s742_s0 = inlined_call_operand.vmem [shape: f32[2,1,4,256], index: 0, kind: input, shape index: {}]   ;;  %s743_s1 = inlined_call_operand.vmem [shape: f32[2,1,4,1], index: 1, kind: input, shape index: {}]   ;;  %s744_s2 = inlined_call_operand.vmem [shape: f32[2,1,4,1], index: 2, kind: input, shape index: {}]   ;;  %s745_s3 = inlined_call_operand.hbm [shape: f32[2,1,4,256], index: 3, kind: output, shape index: {}]  }
   0x1   :  { %10 = vsyncpa [#allocation3 + $0x1], 0  ;;  %s627_s12 = smov 0   ;;  %s629_s13 = smov 0  }
   0x2   :  { %s631_s14 = smov 0   ;;  %s633_s15 = smov 0  }
   0x3   :  { %s635_s16 = smov 0   ;;  %s637_s17 = smov 0  }
   0x4 LB: > { %s447_s18 = sadd.s32 4294967295, %s602_s17   ;;  %s448_s19 = sadd.s32 4294967294, %s602_s17   ;;  %s602_s17 = sphi %s637_s17, %s16_s17   ;;  %s598_s16 = sphi %s635_s16, %s752_s16   ;;  %s594_s15 = sphi %s633_s15, %s751_s15   ;;  %s590_s14 = sphi %s631_s14, %s750_s14   ;;  %s586_s13 = sphi %s629_s13, %s749_s13   ;;  %s582_s12 = sphi %s627_s12, %s748_s12  }
   0x5   : > { %s28_s20 = sadd.s32 1, %s598_s16  ;;  %s121_s21 = sadd.s32 1, %s590_s14 }
   0x6   : > { %p30_p0 = scmp.ge.s32.totalorder %s28_s20, 2  ;;  %p131_p1 = scmp.ne.s32.totalorder %s590_s14, %s586_s13 }
   0x7   : > { %p132_p2 = scmp.eq.s32.totalorder %s447_s18, 1  ;;  %p137_p3 = scmp.ne.s32.totalorder %s586_s13, %s582_s12 }
   0x8   : > { %s754_s20 = smov (%p30_p0, %s28_s20), 0  ;;  %p138_p5 = scmp.eq.s32.totalorder %s448_s19, 1 }
   0x9   : > { %p667_p4 = por %p132_p2, %p131_p1  ;;  %s116_s23 = ssub.s32 %s598_s16, %s754_s20 }
   0xa   : > { %p451_p6 = scmp.ge.s32.totalorder %s602_s17, 1  ;;  %p119_p7 = scmp.eq.s32.totalorder %s116_s23, 0 }
   0xb   : > { %p674_p8 = por %p138_p5, %p137_p3  ;;  %p188_p9 = scmp.lt.s32.totalorder %s602_s17, 3 }
   0xc   : > { %s680_s25 = scalar_select %p119_p7, %s590_s14, %s121_s21  }
   0xd   : > { %p189_p10 = pnand %p451_p6, %p188_p9 }
   0xe   : > { %p230_p11 = scmp.lt.s32.totalorder (!%p189_p10), %s594_s15, 1  ;;  %s227_s11 = sand.u32 (!%p189_p10), 1, %s586_s13  }
   0xf   : > { %192 = sbr.rel (%p189_p10) target bundleno = 508 (0x1fc), region = 32  ;;  %s452_s18 = sshll.u32 (!%p189_p10), %s227_s11, 3 }
  0x10   : > { %s463_s19 = sshll.u32 (!%p189_p10), %s594_s15, 7  ;;  %s229_s21 = scalar_lea.vmem (!%p189_p10), [#allocation2], %s452_s18 }
  0x11   : > { %s338_s23 = sshll.u32 (!%p189_p10), %s229_s21, 4  ;;  %s336_s28 = scalar_lea.hbm (!%p189_p10), %s745_s3, %s463_s19  ;;  %s339_s23 = int_to_ptr.vmem [resolvable:$true] %s338_s23 }
  0x12   : > { %s322_s29 = scalar_lea.sflag (!%p189_p10), [#allocation3], %s227_s11 }
  0x14   : > { %s684_s26 = scalar_select %p230_p11, %s594_s15, 1  ;;  %vm257_vm0 = vcmask 1043456   ;;  %v604_v20 = vmov 0   ;;  %v605_v35 = vmov 839922192   ;;  %v300_v37 = vlaneseq }
  0x15   : > { %521 = vset.pattern.permute.xlu1 %v604_v20  ;;  %522 = vset.pattern.permute.xlu0 %v604_v20  ;;  %v298_v36 = vunpack.c.l.s4 %v605_v35 }
  0x16   : > { %s462_s27 = sshll.u32 %s684_s26, 3  ;;  %s455_s4 = sshll.u32 %s684_s26, 2  ;;  %v301_v39 = vshrl.u32 %v300_v37, 7 }
  0x17   : > { %s238_s30 = scalar_lea.vmem %s742_s0, %s462_s27  ;;  %s245_s7 = scalar_lea.vmem %s743_s1, %s455_s4  ;;  %v299_v38 = vunpack.c.0.s8 %v298_v36 }
  0x18   : > { %v253_v0 = vld [vmem:[%s238_s30] sm:$0xff]  ;;  %s252_s10 = scalar_lea.vmem %s744_s2, %s455_s4  ;;  %s526_s30 = scalar_lea.vmem %s339_s23, 128 }
  0x19   : > { %v255_v1 = vcombine.high %v253_v0, %v253_v0  ;;  %v258_v2 = vsel %vm257_vm0, %v253_v0, 0.0  ;;  %v291_v31 = vld [vmem:[%s245_s7] sm:$0xf]  ;;  %v302_v40 = vsub.s32 %v299_v38, %v301_v39  ;;  %p527_p12 = scmp.ne.s32.totalorder %s339_s23, %s526_s30  ;;  %s606_s4 = smov [#allocation2]  }
  0x1a   : > { %v306_v34 = vld [vmem:[%s252_s10] sm:$0xf]  ;;  %s530_s5 = sshll.u32 %s606_s4, 4  ;;  %s531_s5 = int_to_ptr.vmem [resolvable:$false] %s530_s5 }
  0x1b   : > { %v259_v3 = vsel %vm257_vm0, %v255_v1, 0.0  ;;  %p528_p13 = pnand %p527_p12, %p667_p4  ;;  %s532_s15 = scalar_lea.vmem %s531_s5, 256 }
  0x1c   : > { %v260_v4 = vadd.f32 %v259_v3, %v258_v2  ;;  %p533_p1 = scmp.lt.s32.totalorder %s339_s23, %s531_s5  ;;  %p534_p2 = scmp.lt.s32.totalorder %s532_s15, %s526_s30 }
  0x1d   : > { %p529_p0 = pneg %p528_p13 }
  0x1e   : > { %261 = vadd.xlane.f32.xlu0 %v260_v4  ;;  %p535_p3 = por %p534_p2, %p533_p1 }
  0x20   : > { %p536_p5 = pnand %p535_p3, %p529_p0 }
  0xa7   : > { %v262_v5 = vpop.xlane.xlu0 %261 }
  0xa8   : > { %v263_v6 = vsel %vm257_vm0, %v262_v5, 0.0 }
  0xa9   : > { %v264_v7 = vrot.slane %v263_v6, 4 }
  0xab   : > { %v265_v8 = vadd.f32 %v264_v7, %v263_v6 }
  0xad   : > { %v266_v9 = vrot.slane %v265_v8, 2 }
  0xaf   : > { %v267_v10 = vadd.f32 %v266_v9, %v265_v8 }
  0xb1   : > { %v268_v11 = vrot.slane %v267_v10, 1 }
  0xb3   : > { %v269_v12 = vadd.f32 %v268_v11, %v267_v10 }
  0xb5   : > { %v270_v13 = vmul.f32 0.0009765625, %v269_v12 }
  0xb7   : > { %v271_v14 = vsub.f32 %v253_v0, %v270_v13 }
  0xb9   : > { %v272_v15 = vmul.f32 %v271_v14, %v271_v14 }
  0xbb   : > { %v274_v16 = vcombine.high %v272_v15, %v272_v15  ;;  %v276_v17 = vsel %vm257_vm0, %v272_v15, 0.0 }
  0xbd   : > { %v277_v18 = vsel %vm257_vm0, %v274_v16, 0.0 }
  0xbe   : > { %v278_v19 = vadd.f32 %v277_v18, %v276_v17 }
  0xc0   : > { %279 = vadd.xlane.f32.xlu0 %v278_v19 }
 0x149   : > { %v280_v21 = vpop.xlane.xlu0 %279 }
 0x14a   : > { %v281_v22 = vsel %vm257_vm0, %v280_v21, 0.0 }
 0x14b   : > { %v282_v23 = vrot.slane %v281_v22, 4 }
 0x14d   : > { %v283_v24 = vadd.f32 %v282_v23, %v281_v22 }
 0x14f   : > { %v284_v25 = vrot.slane %v283_v24, 2 }
 0x151   : > { %v285_v26 = vadd.f32 %v284_v25, %v283_v24 }
 0x153   : > { %v286_v27 = vrot.slane %v285_v26, 1 }
 0x155   : > { %v287_v28 = vadd.f32 %v286_v27, %v285_v26 }
 0x157   : > { %v288_v29 = vmul.f32 0.0009765625, %v287_v28 }
 0x159   : > { %v289_v30 = vadd.f32 1e-06, %v288_v29 }
 0x15b   : > { %524 = vrsqrt.f32 %v289_v30 }
 0x168   : > { %v525_v32 = vpop.eup %524 }
 0x169   : > { %v292_v33 = vmul.f32 %v525_v32, %v291_v31 }
 0x16b   : > { %295 = vperm.xlu1 %521, %v292_v33  }
 0x16f   : > { %309 = vperm.xlu1 %521, %v306_v34  }
 0x1e6   : > { %v296_v41 = vpop.permute.xlu1 %295 }
 0x1e7   : > { %v303_v42 = vrot.slane %v296_v41, %v302_v40 }
 0x1e9   : > { %v305_v44 = vmul.f32 %v303_v42, %v271_v14 }
 0x1ea   : > { %v310_v43 = vpop.permute.xlu1 %309 }
 0x1eb   : > { %v317_v45 = vrot.slane %v310_v43, %v302_v40 }
 0x1ed   : > { %v319_v46 = vadd.f32 %v317_v45, %v305_v44 }
 0x1ef   : > { %320 = vst [vmem:[%s229_s21] sm:$0xff] %v319_v46 }
 0x1f0   : > { %539 = shalt.err (!%p536_p5)
}
 0x1f1   : > { %s540_s6 = scalar_lea.hbm %s336_s28, 128  ;;  %s544_s9 = scalar_lea.hbm %s745_s3, 256 }
 0x1f2   : > { %p541_p6 = scmp.ne.s32.totalorder %s336_s28, %s540_s6  ;;  %p545_p10 = scmp.lt.s32.totalorder %s336_s28, %s745_s3 }
 0x1f3   : > { %p546_p11 = scmp.lt.s32.totalorder %s544_s9, %s540_s6 }
 0x1f4   : > { %p542_p7 = pnand %p541_p6, %p667_p4 }
 0x1f5   : > { %p547_p12 = por %p546_p11, %p545_p10 }
 0x1f6   : > { %p543_p9 = pneg %p542_p7 }
 0x1f8   : > { %p548_p13 = pnand %p547_p12, %p543_p9 }
 0x1fa   : > { %551 = shalt.err (!%p548_p13)
}
 0x1fb   : > { %464 = dma.vmem_to_hbm [thread:$0]  (%p667_p4), %s339_s23, 128, %s336_s28, %s322_s29  }
 0x1fc PF: > { %p470_p0 = scmp.ge.s32.totalorder %s602_s17, 2  ;;  %s350_s18 = sand.u32 1, %s582_s12  }
 0x1fd   : > { %s351_s19 = scalar_lea.sflag [#allocation3], %s350_s18 }
 0x1fe   : > { %p467_p1 = pnand %p470_p0, %p674_p8 }
 0x200   : > { %p468_p2 = pneg %p467_p1 }
 0x202   : > { %577 = dma.done.wait (%p468_p2), %s351_s19, 128  }
 0x203   : > { %579 = vsyncadd (%p468_p2), %s351_s19, 4294967168  ;;  %s16_s17 = sadd.s32 1, %s602_s17   ;;  %s748_s12 = smov %s586_s13 }
 0x204   : > { %p13_p3 = scmp.ge.s32.totalorder %s16_s17, 4   ;;  %s749_s13 = smov %s590_s14 }
 0x205   : > { %s750_s14 = smov %s680_s25  ;;  %s751_s15 = smov %s598_s16 }
 0x206   : > { %s752_s16 = smov %s754_s20  ;;  %15 = sbr.rel (!%p13_p3) target bundleno = 4 (0x4), region = 73 }
 0x20b   :  { %356 = vsyncpa [#allocation3], 1 }
 0x20c   :  { %358 = vsyncpa [#allocation3 + $0x1], 1 }

</bundles_post_ra>
